<compile_context>
chip_gen: v7x
topology: tpu7x:2x2x1
jax: 0.10.0
libtpu: 0.0.40
codegen_flags: <defaults>
</compile_context>

<pallas_src>
import functools
import math

import jax
import jax.numpy as jnp
from jax.experimental import pallas as pl
from jax.experimental.pallas import tpu as pltpu


_VMEM_LIMIT = 48 * 1024 * 1024       # safe headroom under v7x's 64 MiB physical VMEM


def _target_block_bytes():
    """Generation-aware per-block byte target: v7x has ~2.3x the HBM BW of v6e with the
    same ~0.35us per-grid-step overhead, so it wants ~2x larger blocks."""
    try:
        info = pltpu.get_tpu_info()
        if "7" in str(getattr(info, "chip_version", "")):
            return 8 << 20
    except Exception:
        pass
    return 4 << 20


def _pick_row_tile(rows, bytes_per_row):
    """Byte-targeted batch-row tile.

    Big enough to amortize the per-grid-step overhead, small enough that (a) the 1-D
    'parallel' grid keeps >= 2 blocks so both v7x TensorCores get work and (b) the
    double-buffered blocks stay far below the VMEM limit.
    """
    if rows <= 8:
        return rows                                   # block dim == full array dim
    tm = max(8, int(_target_block_bytes() // max(int(bytes_per_row), 1)))
    half = -(-rows // 2)                              # ceil(rows / 2): >= 2 grid blocks
    tm = min(tm, ((half + 7) // 8) * 8)
    tm = (min(tm, rows) // 8) * 8                     # multiple of 8 (sublane tile)
    return max(tm, 8)


def _sigmoid(x):
    return 1.0 / (1.0 + jnp.exp(-x))


def _compiler_params():
    return pltpu.CompilerParams(dimension_semantics=("parallel",),
                                vmem_limit_bytes=_VMEM_LIMIT)


# ----------------------------------------------------------------------------
# Kernel 1: fused additive attention (the `Attention` sub-module)
# ----------------------------------------------------------------------------
def _attention_kernel(h_ref, p_att_ref, feat_ref, mask_ref, w_ref, b_ref, wa_ref,
                      o_ref, *, b_alpha):
    h = h_ref[...]                                                    # (bm, R)
    att_h = jnp.dot(h, w_ref[...],
                    preferred_element_type=jnp.float32) + b_ref[...]  # (bm, A)
    dot = jnp.tanh(p_att_ref[...] + att_h[:, None, :])                # (bm, S, A)
    # alpha_net: (bm,S,A).(A,) -> (bm,S).  b_alpha only shifts every logit equally
    # (softmax-invariant); kept for faithfulness to the reference module.
    scores = jnp.sum(dot * wa_ref[...][None, :, :], axis=-1) + b_alpha
    scores = scores - jnp.max(scores, axis=-1, keepdims=True)
    e = jnp.exp(scores)
    p = e / jnp.sum(e, axis=-1, keepdims=True)                        # softmax over regions
    p = p * mask_ref[...]                                             # PyTorch order:
    p = p / jnp.sum(p, axis=-1, keepdims=True)                        # mask then renormalize
    # weighted pooling of att_feats; for large att_size this becomes a batched MXU
    # matmul / flash-style streaming loop over the region axis.
    att_res = jnp.sum(p[:, :, None] * feat_ref[...], axis=1)          # (bm, F)
    o_ref[...] = att_res.astype(o_ref.dtype)


def attention(h, att_feats, p_att_feats, att_masks, params):
    B, S, F = att_feats.shape
    A = p_att_feats.shape[-1]
    R = h.shape[-1]
    bm = _pick_row_tile(B, 4 * (S * (A + F + 1) + R + F))
    kernel = functools.partial(_attention_kernel, b_alpha=float(params["b_alpha"]))
    return pl.pallas_call(
        kernel,
        out_shape=jax.ShapeDtypeStruct((B, F), h.dtype),
        grid_spec=pltpu.PrefetchScalarGridSpec(
            num_scalar_prefetch=0,
            grid=(pl.cdiv(B, bm),),
            in_specs=[
                pl.BlockSpec((bm, R), lambda i: (i, 0)),
                pl.BlockSpec((bm, S, A), lambda i: (i, 0, 0)),
                pl.BlockSpec((bm, S, F), lambda i: (i, 0, 0)),
                pl.BlockSpec((bm, S), lambda i: (i, 0)),
                pl.BlockSpec((R, A), lambda i: (0, 0)),      # weights: constant blocks,
                pl.BlockSpec((1, A), lambda i: (0, 0)),      # fetched once and reused
                pl.BlockSpec((1, A), lambda i: (0, 0)),
            ],
            out_specs=pl.BlockSpec((bm, F), lambda i: (i, 0)),
        ),
        compiler_params=_compiler_params(),
    )(h, p_att_feats, att_feats, att_masks,
      params["w_h2att"], params["b_h2att"].reshape(1, A), params["w_alpha"].reshape(1, A))


# ----------------------------------------------------------------------------
# Kernel 2: fused nn.LSTMCell
# ----------------------------------------------------------------------------
def _lstm_cell_kernel(x_ref, h_ref, c_ref, wih_ref, whh_ref, b_ref,
                      h_out_ref, c_out_ref, *, hidden):
    gates = (jnp.dot(x_ref[...], wih_ref[...], preferred_element_type=jnp.float32)
             + jnp.dot(h_ref[...], whh_ref[...], preferred_element_type=jnp.float32)
             + b_ref[...])                                            # (bm, 4H)
    i = _sigmoid(gates[:, 0 * hidden:1 * hidden])
    f = _sigmoid(gates[:, 1 * hidden:2 * hidden])
    g = jnp.tanh(gates[:, 2 * hidden:3 * hidden])
    o = _sigmoid(gates[:, 3 * hidden:4 * hidden])
    c_new = f * c_ref[...] + i * g
    h_out_ref[...] = (o * jnp.tanh(c_new)).astype(h_out_ref.dtype)
    c_out_ref[...] = c_new.astype(c_out_ref.dtype)


def lstm_cell(x, h, c, wih, whh, b):
    B, din = x.shape
    H = h.shape[-1]
    bm = _pick_row_tile(B, 4 * (din + 8 * H))
    return pl.pallas_call(
        functools.partial(_lstm_cell_kernel, hidden=H),
        out_shape=(jax.ShapeDtypeStruct((B, H), x.dtype),
                   jax.ShapeDtypeStruct((B, H), x.dtype)),
        grid_spec=pltpu.PrefetchScalarGridSpec(
            num_scalar_prefetch=0,
            grid=(pl.cdiv(B, bm),),
            in_specs=[
                pl.BlockSpec((bm, din), lambda i: (i, 0)),
                pl.BlockSpec((bm, H), lambda i: (i, 0)),
                pl.BlockSpec((bm, H), lambda i: (i, 0)),
                pl.BlockSpec((din, 4 * H), lambda i: (0, 0)),
                pl.BlockSpec((H, 4 * H), lambda i: (0, 0)),
                pl.BlockSpec((1, 4 * H), lambda i: (0, 0)),
            ],
            out_specs=[pl.BlockSpec((bm, H), lambda i: (i, 0)),
                       pl.BlockSpec((bm, H), lambda i: (i, 0))],
        ),
        compiler_params=_compiler_params(),
    )(x, h, c, wih, whh, b.reshape(1, 4 * H))


# ----------------------------------------------------------------------------
# Kernel 3: fused Memory_cell2  (softmax(h @ M^T) @ M)
# ----------------------------------------------------------------------------
def _memory_cell_kernel(h_ref, m_ref, o_ref):
    h = h_ref[...]                                                    # (bm, R)
    m = m_ref[...]                                                    # (K, R)
    scores = jax.lax.dot_general(h, m, (((1,), (1,)), ((), ())),
                                 preferred_element_type=jnp.float32)  # (bm, K)
    scores = scores - jnp.max(scores, axis=-1, keepdims=True)
    e = jnp.exp(scores)
    att = e / jnp.sum(e, axis=-1, keepdims=True)
    o_ref[...] = jnp.dot(att, m, preferred_element_type=jnp.float32).astype(o_ref.dtype)


def memory_cell(h, memory):
    B, R = h.shape
    K = memory.shape[0]
    bm = _pick_row_tile(B, 4 * (2 * R + K))
    return pl.pallas_call(
        _memory_cell_kernel,
        out_shape=jax.ShapeDtypeStruct((B, R), h.dtype),
        grid_spec=pltpu.PrefetchScalarGridSpec(
            num_scalar_prefetch=0,
            grid=(pl.cdiv(B, bm),),
            in_specs=[pl.BlockSpec((bm, R), lambda i: (i, 0)),
                      pl.BlockSpec((K, R), lambda i: (0, 0))],
            out_specs=pl.BlockSpec((bm, R), lambda i: (i, 0)),
        ),
        compiler_params=_compiler_params(),
    )(h, memory)


# ----------------------------------------------------------------------------
# Kernel 4: fused Linear (+ optional ReLU) for lang_embed / mem_fc / query_fc
# ----------------------------------------------------------------------------
def _linear_kernel(x_ref, w_ref, b_ref, o_ref, *, relu):
    y = jnp.dot(x_ref[...], w_ref[...], preferred_element_type=jnp.float32) + b_ref[...]
    if relu:
        y = jnp.maximum(y, 0.0)
    o_ref[...] = y.astype(o_ref.dtype)


def linear(x, w, b, relu):
    B, din = x.shape
    dout = w.shape[-1]
    bm = _pick_row_tile(B, 4 * (din + dout))
    return pl.pallas_call(
        functools.partial(_linear_kernel, relu=relu),
        out_shape=jax.ShapeDtypeStruct((B, dout), x.dtype),
        grid_spec=pltpu.PrefetchScalarGridSpec(
            num_scalar_prefetch=0,
            grid=(pl.cdiv(B, bm),),
            in_specs=[pl.BlockSpec((bm, din), lambda i: (i, 0)),
                      pl.BlockSpec((din, dout), lambda i: (0, 0)),
                      pl.BlockSpec((1, dout), lambda i: (0, 0))],
            out_specs=pl.BlockSpec((bm, dout), lambda i: (i, 0)),
        ),
        compiler_params=_compiler_params(),
    )(x, w, b.reshape(1, dout))


# ----------------------------------------------------------------------------
# Pure-JAX reference implementations (PyTorch semantics) for correctness checks
# ----------------------------------------------------------------------------
def ref_attention(h, att_feats, p_att_feats, att_masks, params):
    att_h = h @ params["w_h2att"] + params["b_h2att"]
    dot = jnp.tanh(p_att_feats + att_h[:, None, :])
    scores = jnp.sum(dot * params["w_alpha"][None, None, :], axis=-1) + params["b_alpha"]
    w = jax.nn.softmax(scores, axis=1)
    w = w * att_masks
    w = w / jnp.sum(w, axis=1, keepdims=True)
    return jnp.einsum("bs,bsf->bf", w, att_feats)


def ref_lstm_cell(x, h, c, wih, whh, b):
    H = h.shape[-1]
    gates = x @ wih + h @ whh + b
    i = _sigmoid(gates[:, :H])
    f = _sigmoid(gates[:, H:2 * H])
    g = jnp.tanh(gates[:, 2 * H:3 * H])
    o = _sigmoid(gates[:, 3 * H:])
    c_new = f * c + i * g
    return o * jnp.tanh(c_new), c_new


def ref_memory_cell(h, memory):
    att = jax.nn.softmax(h @ memory.T, axis=1)
    return att @ memory


def ref_linear(x, w, b, relu):
    y = x @ w + b
    return jnp.maximum(y, 0.0) if relu else y


# ----------------------------------------------------------------------------
# Mod_Cont controller (MultiHeadedAttention + FFN), eval mode, plain JAX
# ----------------------------------------------------------------------------
def mod_cont(query, module_embeddings, p, n_heads=8):
    # TODO(synk): tiny (q_len == 1) controller MHA kept in plain JAX; a flash-style
    # Pallas kernel only pays off for long module_embeddings sequences.
    B, T, E = module_embeddings.shape
    dk = E // n_heads
    q = (query @ p["wq"] + p["bq"]).reshape(B, 1, n_heads, dk).transpose(0, 2, 1, 3)
    k = (module_embeddings @ p["wk"] + p["bk"]).reshape(B, T, n_heads, dk).transpose(0, 2, 1, 3)
    v = (module_embeddings @ p["wv"] + p["bv"]).reshape(B, T, n_heads, dk).transpose(0, 2, 1, 3)
    scores = jnp.einsum("bhqd,bhkd->bhqk", q, k) / math.sqrt(dk)
    attn = jax.nn.softmax(scores, axis=-1)
    x = jnp.einsum("bhqk,bhkd->bhqd", attn, v)
    x = x.transpose(0, 2, 1, 3).reshape(B, 1, E)
    x = x @ p["wo"] + p["bo"]
    h = jnp.maximum(x @ p["ff_w1"] + p["ff_b1"], 0.0) @ p["ff_w2"] + p["ff_b2"]
    return jnp.squeeze(h, axis=1)        # (B, E); batch > 1 so only the seq dim drops


# ----------------------------------------------------------------------------
# TopDownCore.forward (combine_att='concat', relu_mod='relu', cont_ver=1,
# topdown_res=0, beam_search=0, eval mode)
# ----------------------------------------------------------------------------
def topdown_core_forward(params, xt, rs_data, state, ops):
    h_att_prev, h_lang_prev = state[0][0], state[0][1]
    c_att_prev, c_lang_prev = state[1][0], state[1][1]

    att_lstm_input = jnp.concatenate([h_lang_prev, rs_data["fc_feats_new"], xt], axis=1)
    h_att, c_att = ops["lstm_cell"](att_lstm_input, h_att_prev, c_att_prev,
                                    *params["att_lstm"])

    att_obj = ops["attention"](h_att, rs_data["obj_feats_new"], rs_data["p_obj_feats"],
                               rs_data["att_masks"], params["att_obj"])
    att_attr = ops["attention"](h_att, rs_data["attr_feats_new"], rs_data["p_attr_feats"],
                                rs_data["attr_masks"], params["att_attr"])
    att_rela = ops["attention"](h_att, rs_data["rela_feats_new"], rs_data["p_rela_feats"],
                                rs_data["rela_masks"], params["att_rela"])
    att_lang = ops["linear"](c_lang_prev, *params["lang_embed"], True)

    # ---- controller (cont_ver == 1, greedy / non-beam path) ----
    query = ops["linear"](att_lstm_input, *params["query_fc"], False)
    h_new = mod_cont(query, rs_data["module_embeddings"], params["cont"])
    logits = h_new @ params["w_cont"] + params["b_cont"]
    cont_w = jax.nn.softmax(logits, axis=1)
    cw_logit = jax.nn.log_softmax(logits, axis=1)
    att_obj = att_obj * cont_w[:, 1:2]
    att_attr = att_attr * cont_w[:, 3:4]
    att_rela = att_rela * cont_w[:, 2:3]
    att_lang = att_lang * cont_w[:, 0:1]
    me_new = cont_w @ params["embeds"]                       # sum_k w_k * embed_k
    module_embeddings = jnp.concatenate(
        [rs_data["module_embeddings"], me_new[:, None, :]], axis=1)

    att = jnp.concatenate([att_obj, att_attr, att_rela, att_lang], axis=1)  # 'concat'
    lang_lstm_input = jnp.concatenate([att, h_att], axis=1)
    query_mem = ops["linear"](lang_lstm_input, *params["mem_fc"], True)
    lang_mem = ops["memory_cell"](query_mem, rs_data["memory_cell"])
    lang_lstm_input = jnp.concatenate([lang_lstm_input, lang_mem], axis=1)
    h_lang, c_lang = ops["lstm_cell"](lang_lstm_input, h_lang_prev, c_lang_prev,
                                      *params["lang_lstm"])

    # topdown_res == 0 -> no residual.
    # TODO(synk): F.dropout(h_lang, drop_prob_lm, training) is identity in eval mode.
    output = h_lang
    new_state = (jnp.stack([h_att, h_lang, h_new]), jnp.stack([c_att, c_lang, h_new]))
    return output, new_state, cw_logit, module_embeddings


# ----------------------------------------------------------------------------
# Demo / self-test
# ----------------------------------------------------------------------------
def _dense(key, fan_in, fan_out):
    kw, kb = jax.random.split(key)
    w = jax.random.normal(kw, (fan_in, fan_out), jnp.float32) / math.sqrt(fan_in)
    b = jax.random.normal(kb, (fan_out,), jnp.float32) * 0.01
    return w, b


def _lstm_params(key, din, hidden):
    k1, k2, k3 = jax.random.split(key, 3)
    wih = jax.random.normal(k1, (din, 4 * hidden), jnp.float32) / math.sqrt(din)
    whh = jax.random.normal(k2, (hidden, 4 * hidden), jnp.float32) / math.sqrt(hidden)
    b = jax.random.normal(k3, (4 * hidden,), jnp.float32) * 0.01
    return wih, whh, b


def _attn_params(key, rnn, att_hid):
    k1, k2, k3, k4 = jax.random.split(key, 4)
    return {
        "w_h2att": jax.random.normal(k1, (rnn, att_hid), jnp.float32) / math.sqrt(rnn),
        "b_h2att": jax.random.normal(k2, (att_hid,), jnp.float32) * 0.01,
        "w_alpha": jax.random.normal(k3, (att_hid,), jnp.float32) / math.sqrt(att_hid),
        "b_alpha": float(jax.random.normal(k4, (), jnp.float32) * 0.01),
    }


if __name__ == "__main__":
    # rnn_size == input_encoding_size == att_hid_size (required by query_fc / Mod_Cont);
    # 128 keeps every kernel output lane-dense (multiple of 128).
    B, R, E, A = 4, 128, 128, 128
    S = 16            # attention regions (obj / attr / rela)
    K_MEM, T_MOD = 16, 3

    keys = iter(jax.random.split(jax.random.PRNGKey(0), 40))

    params = {
        "att_lstm": _lstm_params(next(keys), E + 2 * R, R),
        "lang_lstm": _lstm_params(next(keys), 6 * R, R),       # combine_att='concat'
        "query_fc": _dense(next(keys), 3 * E, E),
        "lang_embed": _dense(next(keys), R, R),
        "mem_fc": _dense(next(keys), 5 * R, R),
        "att_obj": _attn_params(next(keys), R, A),
        "att_attr": _attn_params(next(keys), R, A),
        "att_rela": _attn_params(next(keys), R, A),
        "embeds": jax.random.normal(next(keys), (4, E), jnp.float32),   # embed1..embed4
    }
    cont = {}
    for name in ("q", "k", "v", "o"):
        cont["w" + name], cont["b" + name] = _dense(next(keys), E, E)
    cont["ff_w1"], cont["ff_b1"] = _dense(next(keys), E, E)             # d_ff == d_model
    cont["ff_w2"], cont["ff_b2"] = _dense(next(keys), E, E)
    params["cont"] = cont
    params["w_cont"], params["b_cont"] = _dense(next(keys), R, 4)

    def make_mask(valid):
        return (jnp.arange(S)[None, :] < jnp.array(valid)[:, None]).astype(jnp.float32)

    xt = jax.random.normal(next(keys), (B, E), jnp.float32)
    rs_data = {
        "fc_feats_new": jax.random.normal(next(keys), (B, R), jnp.float32),
        "obj_feats_new": jax.random.normal(next(keys), (B, S, R), jnp.float32),
        "p_obj_feats": jax.random.normal(next(keys), (B, S, A), jnp.float32),
        "att_masks": make_mask([16, 12, 8, 14]),
        "attr_feats_new": jax.random.normal(next(keys), (B, S, R), jnp.float32),
        "p_attr_feats": jax.random.normal(next(keys), (B, S, A), jnp.float32),
        "attr_masks": make_mask([16, 16, 10, 6]),
        "rela_feats_new": jax.random.normal(next(keys), (B, S, R), jnp.float32),
        "p_rela_feats": jax.random.normal(next(keys), (B, S, A), jnp.float32),
        "rela_masks": make_mask([9, 16, 16, 12]),
        "memory_cell": jax.random.normal(next(keys), (K_MEM, R), jnp.float32),
        "module_embeddings": jax.random.normal(next(keys), (B, T_MOD, E), jnp.float32) * 0.1,
    }
    state = (jax.random.normal(next(keys), (2, B, R), jnp.float32) * 0.1,
             jax.random.normal(next(keys), (2, B, R), jnp.float32) * 0.1)

    PALLAS_OPS = {"attention": attention, "lstm_cell": lstm_cell,
                  "memory_cell": memory_cell, "linear": linear}
    REF_OPS = {"attention": ref_attention, "lstm_cell": ref_lstm_cell,
               "memory_cell": ref_memory_cell, "linear": ref_linear}

    out, new_state, cw_logit, mod_emb = topdown_core_forward(
        params, xt, rs_data, state, PALLAS_OPS)
    out = jax.block_until_ready(out)

    out_r, state_r, cw_r, me_r = topdown_core_forward(params, xt, rs_data, state, REF_OPS)

    # Tolerance covers MXU f32 multi-pass precision differences between the Mosaic
    # (in-kernel) and XLA (reference) dot lowerings; everything is O(1)-scaled.
    def check(a, b, name):
        assert jnp.allclose(a, b, atol=2e-2, rtol=2e-2), f"mismatch vs reference: {name}"

    check(out, out_r, "output")
    check(cw_logit, cw_r, "cw_logit")
    check(new_state[0], state_r[0], "state_h")
    check(new_state[1], state_r[1], "state_c")
    check(mod_emb, me_r, "module_embeddings")
    print("KERNEL_OK")
</pallas_src>

<mosaic_0001>
module attributes {stable_mosaic.version = 11 : i64} {
  func.func @_lstm_cell_kernel(%arg0: i32, %arg1: memref<4x384xf32, #tpu.memory_space<vmem>>, %arg2: memref<4x128xf32, #tpu.memory_space<vmem>>, %arg3: memref<4x128xf32, #tpu.memory_space<vmem>>, %arg4: memref<384x512xf32, #tpu.memory_space<vmem>>, %arg5: memref<128x512xf32, #tpu.memory_space<vmem>>, %arg6: memref<1x512xf32, #tpu.memory_space<vmem>>, %arg7: memref<4x128xf32, #tpu.memory_space<vmem>>, %arg8: memref<4x128xf32, #tpu.memory_space<vmem>>) attributes {dimension_semantics = [#tpu.dimension_semantics<parallel>], iteration_bounds = array<i64: 1>, scalar_prefetch = 0 : i64, scratch_operands = 0 : i64, tpu.core_type = #tpu.core_type<tc>, window_params = [{transform_indices = @transform_0, window_bounds = array<i64: 4, 384>}, {transform_indices = @transform_1, window_bounds = array<i64: 4, 128>}, {transform_indices = @transform_2, window_bounds = array<i64: 4, 128>}, {pipeline_mode = #tpu.pipeline_mode<synchronous>, transform_indices = @transform_3, window_bounds = array<i64: 384, 512>}, {pipeline_mode = #tpu.pipeline_mode<synchronous>, transform_indices = @transform_4, window_bounds = array<i64: 128, 512>}, {pipeline_mode = #tpu.pipeline_mode<synchronous>, transform_indices = @transform_5, window_bounds = array<i64: 1, 512>}, {transform_indices = @transform_6, window_bounds = array<i64: 4, 128>}, {transform_indices = @transform_7, window_bounds = array<i64: 4, 128>}]} {
    %c0 = arith.constant 0 : index
    %c0_0 = arith.constant 0 : index
    %0 = vector.load %arg1[%c0, %c0_0] : memref<4x384xf32, #tpu.memory_space<vmem>>, vector<4x384xf32>
    %c0_1 = arith.constant 0 : index
    %c0_2 = arith.constant 0 : index
    %1 = vector.load %arg4[%c0_1, %c0_2] : memref<384x512xf32, #tpu.memory_space<vmem>>, vector<384x512xf32>
    %cst = arith.constant dense<0.000000e+00> : vector<4x512xf32>
    %2 = tpu.matmul %0, %1, %cst {dimension_numbers = #tpu.dot_dimension_numbers<[1], [0], [0], [1], [0, 0, 1, 1], [], []>} : vector<4x384xf32>, vector<384x512xf32>, vector<4x512xf32> -> vector<4x512xf32>
    %c0_3 = arith.constant 0 : index
    %c0_4 = arith.constant 0 : index
    %3 = vector.load %arg2[%c0_3, %c0_4] : memref<4x128xf32, #tpu.memory_space<vmem>>, vector<4x128xf32>
    %c0_5 = arith.constant 0 : index
    %c0_6 = arith.constant 0 : index
    %4 = vector.load %arg5[%c0_5, %c0_6] : memref<128x512xf32, #tpu.memory_space<vmem>>, vector<128x512xf32>
    %cst_7 = arith.constant dense<0.000000e+00> : vector<4x512xf32>
    %5 = tpu.matmul %3, %4, %cst_7 {dimension_numbers = #tpu.dot_dimension_numbers<[1], [0], [0], [1], [0, 0, 1, 1], [], []>} : vector<4x128xf32>, vector<128x512xf32>, vector<4x512xf32> -> vector<4x512xf32>
    %6 = arith.addf %2, %5 : vector<4x512xf32>
    %c0_8 = arith.constant 0 : index
    %c0_9 = arith.constant 0 : index
    %7 = vector.load %arg6[%c0_8, %c0_9] : memref<1x512xf32, #tpu.memory_space<vmem>>, vector<1x512xf32>
    %8 = vector.broadcast %7 : vector<1x512xf32> to vector<4x512xf32>
    %9 = arith.addf %6, %8 : vector<4x512xf32>
    %10 = vector.extract_strided_slice %9 {offsets = [0, 0], sizes = [4, 128], strides = [1, 1]} : vector<4x512xf32> to vector<4x128xf32>
    %cst_10 = arith.constant 0.000000e+00 : f32
    %11 = vector.broadcast %cst_10 : f32 to vector<4x128xf32>
    %12 = arith.subf %11, %10 : vector<4x128xf32>
    %13 = math.exp %12 : vector<4x128xf32>
    %cst_11 = arith.constant 1.000000e+00 : f32
    %14 = vector.broadcast %cst_11 : f32 to vector<4x128xf32>
    %15 = arith.addf %14, %13 : vector<4x128xf32>
    %cst_12 = arith.constant 1.000000e+00 : f32
    %16 = vector.broadcast %cst_12 : f32 to vector<4x128xf32>
    %17 = arith.divf %16, %15 : vector<4x128xf32>
    %18 = vector.extract_strided_slice %9 {offsets = [0, 128], sizes = [4, 128], strides = [1, 1]} : vector<4x512xf32> to vector<4x128xf32>
    %cst_13 = arith.constant 0.000000e+00 : f32
    %19 = vector.broadcast %cst_13 : f32 to vector<4x128xf32>
    %20 = arith.subf %19, %18 : vector<4x128xf32>
    %21 = math.exp %20 : vector<4x128xf32>
    %cst_14 = arith.constant 1.000000e+00 : f32
    %22 = vector.broadcast %cst_14 : f32 to vector<4x128xf32>
    %23 = arith.addf %22, %21 : vector<4x128xf32>
    %cst_15 = arith.constant 1.000000e+00 : f32
    %24 = vector.broadcast %cst_15 : f32 to vector<4x128xf32>
    %25 = arith.divf %24, %23 : vector<4x128xf32>
    %26 = vector.extract_strided_slice %9 {offsets = [0, 256], sizes = [4, 128], strides = [1, 1]} : vector<4x512xf32> to vector<4x128xf32>
    %27 = math.tanh %26 : vector<4x128xf32>
    %28 = vector.extract_strided_slice %9 {offsets = [0, 384], sizes = [4, 128], strides = [1, 1]} : vector<4x512xf32> to vector<4x128xf32>
    %cst_16 = arith.constant 0.000000e+00 : f32
    %29 = vector.broadcast %cst_16 : f32 to vector<4x128xf32>
    %30 = arith.subf %29, %28 : vector<4x128xf32>
    %31 = math.exp %30 : vector<4x128xf32>
    %cst_17 = arith.constant 1.000000e+00 : f32
    %32 = vector.broadcast %cst_17 : f32 to vector<4x128xf32>
    %33 = arith.addf %32, %31 : vector<4x128xf32>
    %cst_18 = arith.constant 1.000000e+00 : f32
    %34 = vector.broadcast %cst_18 : f32 to vector<4x128xf32>
    %35 = arith.divf %34, %33 : vector<4x128xf32>
    %c0_19 = arith.constant 0 : index
    %c0_20 = arith.constant 0 : index
    %36 = vector.load %arg3[%c0_19, %c0_20] : memref<4x128xf32, #tpu.memory_space<vmem>>, vector<4x128xf32>
    %37 = arith.mulf %25, %36 : vector<4x128xf32>
    %38 = arith.mulf %17, %27 : vector<4x128xf32>
    %39 = arith.addf %37, %38 : vector<4x128xf32>
    %40 = math.tanh %39 : vector<4x128xf32>
    %41 = arith.mulf %35, %40 : vector<4x128xf32>
    %c0_21 = arith.constant 0 : index
    %c0_22 = arith.constant 0 : index
    %42 = vector.load %arg7[%c0_21, %c0_22] : memref<4x128xf32, #tpu.memory_space<vmem>>, vector<4x128xf32>
    tpu.vector_store %arg7[%c0_21, %c0_22], %41 {strides = array<i32>} : memref<4x128xf32, #tpu.memory_space<vmem>>, vector<4x128xf32>,
    %c0_23 = arith.constant 0 : index
    %c0_24 = arith.constant 0 : index
    %43 = vector.load %arg8[%c0_23, %c0_24] : memref<4x128xf32, #tpu.memory_space<vmem>>, vector<4x128xf32>
    tpu.vector_store %arg8[%c0_23, %c0_24], %39 {strides = array<i32>} : memref<4x128xf32, #tpu.memory_space<vmem>>, vector<4x128xf32>,
    return
  }
  func.func @transform_0(%arg0: i32) -> (i32, i32) {
    %c0_i32 = arith.constant 0 : i32
    %c0_i32_0 = arith.constant 0 : i32
    return %arg0, %c0_i32 : i32, i32
  }
  func.func @transform_1(%arg0: i32) -> (i32, i32) {
    %c0_i32 = arith.constant 0 : i32
    %c0_i32_0 = arith.constant 0 : i32
    return %arg0, %c0_i32 : i32, i32
  }
  func.func @transform_2(%arg0: i32) -> (i32, i32) {
    %c0_i32 = arith.constant 0 : i32
    %c0_i32_0 = arith.constant 0 : i32
    return %arg0, %c0_i32 : i32, i32
  }
  func.func @transform_3(%arg0: i32) -> (i32, i32) {
    %c0_i32 = arith.constant 0 : i32
    %c0_i32_0 = arith.constant 0 : i32
    %c0_i32_1 = arith.constant 0 : i32
    return %c0_i32, %c0_i32_0 : i32, i32
  }
  func.func @transform_4(%arg0: i32) -> (i32, i32) {
    %c0_i32 = arith.constant 0 : i32
    %c0_i32_0 = arith.constant 0 : i32
    %c0_i32_1 = arith.constant 0 : i32
    return %c0_i32, %c0_i32_0 : i32, i32
  }
  func.func @transform_5(%arg0: i32) -> (i32, i32) {
    %c0_i32 = arith.constant 0 : i32
    %c0_i32_0 = arith.constant 0 : i32
    %c0_i32_1 = arith.constant 0 : i32
    return %c0_i32, %c0_i32_0 : i32, i32
  }
  func.func @transform_6(%arg0: i32) -> (i32, i32) {
    %c0_i32 = arith.constant 0 : i32
    %c0_i32_0 = arith.constant 0 : i32
    return %arg0, %c0_i32 : i32, i32
  }
  func.func @transform_7(%arg0: i32) -> (i32, i32) {
    %c0_i32 = arith.constant 0 : i32
    %c0_i32_0 = arith.constant 0 : i32
    return %arg0, %c0_i32 : i32, i32
  }
}

</mosaic_0001>

<bundles_post_ra>
// kernel: tpu_custom_call.1
= control target key start
LH: loop header
LB: loop body
LE: loop exit
PB: predicated region body
PF: predicated region fallthrough
CT: control target
= control target key end

     0   :  { %13 = vsyncpa [#allocation3], 0  ;;  %s1419_s0 = inlined_call_operand.hbm [shape: f32[4,384], index: 0, kind: input, shape index: {}]   ;;  %s1420_s1 = inlined_call_operand.hbm [shape: f32[4,128], index: 1, kind: input, shape index: {}]   ;;  %s1421_s2 = inlined_call_operand.vmem [shape: f32[4,128], index: 2, kind: input, shape index: {}]   ;;  %s1422_s3 = inlined_call_operand.hbm [shape: f32[384,512], index: 3, kind: input, shape index: {}]   ;;  %s1423_s4 = inlined_call_operand.hbm [shape: f32[128,512], index: 4, kind: input, shape index: {}]   ;;  %s1424_s5 = inlined_call_operand.vmem [shape: f32[1,512], index: 5, kind: input, shape index: {}]   ;;  %s1425_s6 = inlined_call_operand.hbm [shape: f32[4,128], index: 6, kind: output, shape index: {0}]   ;;  %s1426_s7 = inlined_call_operand.hbm [shape: f32[4,128], index: 7, kind: output, shape index: {1}]  }
   0x1   :  { %14 = vsyncpa [#allocation6], 0 }
   0x2   :  { %15 = vsyncpa [#allocation9], 0 }
   0x3   :  { %16 = vsyncpa [#allocation4], 0 }
   0x4   :  { %17 = vsyncpa [#allocation12], 0  ;;  %s1282_s24 = smov [#allocation5]   ;;  %s1283_s26 = smov [#allocation2]  }
   0x5   :  { %s34_s25 = sshll.u32 %s1282_s24, 4  ;;  %s24_s27 = sshll.u32 %s1283_s26, 4  ;;  %s35_s25 = int_to_ptr.vmem [resolvable:$true] %s34_s25  ;;  %s25_s27 = int_to_ptr.vmem [resolvable:$true] %s24_s27 }
   0x6   :  { %s1140_s30 = scalar_lea.hbm %s1420_s1, 64 }
   0x7   :  { %p1141_p0 = scmp.ne.s32.totalorder %s1420_s1, %s1140_s30  ;;  %p1144_p1 = scmp.lt.u32.totalorder %s1140_s30, %s1420_s1 }
   0x9   :  { %p1146_p2 = pnand %p1144_p1, %p1141_p0 }
   0xb   :  { %1149 = shalt.err (!%p1146_p2)
}
   0xc   :  { %s1150_s12 = scalar_lea.vmem %s35_s25, 64  ;;  %p1155_p4 = scmp.lt.s32.totalorder %s35_s25, %s35_s25 }
   0xd   :  { %p1151_p3 = scmp.ne.s32.totalorder %s35_s25, %s1150_s12  ;;  %p1156_p5 = scmp.lt.s32.totalorder %s1150_s12, %s1150_s12 }
   0xf   :  { %p1157_p6 = por %p1156_p5, %p1155_p4 }
  0x11   :  { %p1158_p7 = pnand %p1157_p6, %p1151_p3 }
  0x13   :  { %1161 = shalt.err (!%p1158_p7)
}
  0x14   :  { %37 = dma.hbm_to_vmem [thread:$0]  %s1420_s1, 64, %s35_s25, [#allocation6]  }
  0x15   :  { %s1162_s17 = scalar_lea.hbm %s1419_s0, 192 }
  0x16   :  { %p1163_p8 = scmp.ne.s32.totalorder %s1419_s0, %s1162_s17  ;;  %p1166_p9 = scmp.lt.u32.totalorder %s1162_s17, %s1419_s0 }
  0x18   :  { %p1168_p10 = pnand %p1166_p9, %p1163_p8 }
  0x1a   :  { %1171 = shalt.err (!%p1168_p10)
}
  0x1b   :  { %s1172_s22 = scalar_lea.vmem %s25_s27, 192  ;;  %p1177_p12 = scmp.lt.s32.totalorder %s25_s27, %s25_s27 }
  0x1c   :  { %p1173_p11 = scmp.ne.s32.totalorder %s25_s27, %s1172_s22  ;;  %p1178_p13 = scmp.lt.s32.totalorder %s1172_s22, %s1172_s22 }
  0x1e   :  { %p1179_p0 = por %p1178_p13, %p1177_p12 }
  0x20   :  { %p1180_p1 = pnand %p1179_p0, %p1173_p11 }
  0x22   :  { %1183 = shalt.err (!%p1180_p1)
}
  0x23   :  { %27 = dma.hbm_to_vmem [thread:$0]  %s1419_s0, 192, %s25_s27, [#allocation3]  }
  0x24   :  { %s1284_s24 = smov [#allocation7]   ;;  %s1184_s29 = scalar_lea.hbm %s1422_s3, 24576 }
  0x25   :  { %s45_s25 = sshll.u32 %s1284_s24, 4  ;;  %p1185_p2 = scmp.ne.s32.totalorder %s1422_s3, %s1184_s29  ;;  %s46_s25 = int_to_ptr.vmem [resolvable:$true] %s45_s25 }
  0x26   :  { %p1188_p3 = scmp.lt.u32.totalorder %s1184_s29, %s1422_s3 }
  0x28   :  { %p1190_p4 = pnand %p1188_p3, %p1185_p2 }
  0x2a   :  { %1193 = shalt.err (!%p1190_p4)
}
  0x2b   :  { %s1194_s11 = scalar_lea.vmem %s46_s25, 24576  ;;  %p1199_p6 = scmp.lt.s32.totalorder %s46_s25, %s46_s25 }
  0x2c   :  { %p1195_p5 = scmp.ne.s32.totalorder %s46_s25, %s1194_s11  ;;  %p1200_p7 = scmp.lt.s32.totalorder %s1194_s11, %s1194_s11 }
  0x2e   :  { %p1201_p8 = por %p1200_p7, %p1199_p6 }
  0x30   :  { %p1202_p9 = pnand %p1201_p8, %p1195_p5 }
  0x32   :  { %1205 = shalt.err (!%p1202_p9)
}
  0x33   :  { %s1285_s0 = smov 512   ;;  %s1286_s27 = smov 32  }
  0x34   :  { %51 = dma.hbm_to_vmem [thread:$0]  %s1422_s3, 24576, %s46_s25, [#allocation6], %s1285_s0, %s1285_s0, %s1286_s27  }
  0x35   :  { %s1287_s14 = smov [#allocation8]   ;;  %s1206_s18 = scalar_lea.hbm %s1423_s4, 8192 }
  0x36   :  { %s57_s15 = sshll.u32 %s1287_s14, 4  ;;  %p1207_p10 = scmp.ne.s32.totalorder %s1423_s4, %s1206_s18  ;;  %s58_s15 = int_to_ptr.vmem [resolvable:$true] %s57_s15 }
  0x37   :  { %p1210_p11 = scmp.lt.u32.totalorder %s1206_s18, %s1423_s4 }
  0x39   :  { %p1212_p12 = pnand %p1210_p11, %p1207_p10 }
  0x3b   :  { %1215 = shalt.err (!%p1212_p12)
}
  0x3c   :  { %s1216_s1 = scalar_lea.vmem %s58_s15, 8192  ;;  %p1221_p0 = scmp.lt.s32.totalorder %s58_s15, %s58_s15 }
  0x3d   :  { %p1217_p13 = scmp.ne.s32.totalorder %s58_s15, %s1216_s1  ;;  %p1222_p1 = scmp.lt.s32.totalorder %s1216_s1, %s1216_s1 }
  0x3f   :  { %p1223_p2 = por %p1222_p1, %p1221_p0 }
  0x41   :  { %p1224_p3 = pnand %p1223_p2, %p1217_p13 }
  0x43   :  { %1227 = shalt.err (!%p1224_p3)
}
  0x44   :  { %63 = dma.hbm_to_vmem [thread:$0]  %s1423_s4, 8192, %s58_s15, [#allocation9], %s1285_s0, %s1285_s0, %s1286_s27  }
  0x45   :  { %1272 = dma.done.wait [#allocation3], 192  }
  0x46   :  { %1273 = vsyncadd [#allocation3], 4294967104 }
  0x47   :  { %1274 = dma.done.wait [#allocation6], 24640  }
  0x48   :  { %1275 = vsyncadd [#allocation6], 4294942656 }
  0x49   :  { %1276 = dma.done.wait [#allocation9], 8192  }
  0x4a   :  { %1277 = vsyncadd [#allocation9], 4294959104  ;;  %v1288_v0 = vmov 0.0   ;;  %v274_v1 = vld [vmem:[#allocation8 + $0x8] sm:$0xff]  ;;  %v276_v3 = vld [vmem:[#allocation8 + $0x18] sm:$0xff]  ;;  %s1289_s26 = smov [#allocation11]  }
  0x4b   :  { %401 = vmatprep.mubr.f32.mxu0 %v1288_v0  ;;  %472 = vmatprep.mubr.f32.mxu1 %v1288_v0  ;;  %v278_v2 = vld [vmem:[#allocation8 + $0x28] sm:$0xff]  ;;  %v280_v5 = vld [vmem:[#allocation8 + $0x38] sm:$0xff]  ;;  %v273_v6 = vld [vmem:[#allocation8] sm:$0xff]  ;;  %s835_s28 = sshll.u32 %s1289_s26, 4  ;;  %s836_s28 = int_to_ptr.vmem [resolvable:$true] %s835_s28 }
  0x4c   :  { %v850_v4 = vpack.c.bf16 %v278_v2, %v274_v1  ;;  %v277_v7 = vld [vmem:[#allocation8 + $0x20] sm:$0xff]  ;;  %v882_v8 = vpack.c.bf16 %v280_v5, %v276_v3  ;;  %v275_v10 = vld [vmem:[#allocation8 + $0x10] sm:$0xff]  ;;  %v282_v12 = vld [vmem:[#allocation8 + $0x48] sm:$0xff]  ;;  %s1228_s29 = scalar_lea.vmem %s836_s28, 64  ;;  %p1233_p5 = scmp.lt.s32.totalorder %s836_s28, %s836_s28 }
  0x4d   :  { %v852_v9 = vpack.c.bf16 %v277_v7, %v273_v6  ;;  %v279_v11 = vld [vmem:[#allocation8 + $0x30] sm:$0xff]  ;;  %v286_v14 = vld [vmem:[#allocation8 + $0x68] sm:$0xff]  ;;  %v284_v15 = vld [vmem:[#allocation8 + $0x58] sm:$0xff]  ;;  %p1229_p4 = scmp.ne.s32.totalorder %s836_s28, %s1228_s29  ;;  %p1234_p6 = scmp.lt.s32.totalorder %s1228_s29, %s1228_s29 }
  0x4e   :  { %851 = vmatprep.subr.bf16.mxu0 %v850_v4  ;;  %v884_v13 = vpack.c.bf16 %v279_v11, %v275_v10  ;;  %v288_v16 = vld [vmem:[#allocation8 + $0x78] sm:$0xff]  ;;  %883 = vmatprep.subr.bf16.mxu1 %v882_v8  ;;  %v854_v17 = vpack.c.bf16 %v286_v14, %v282_v12  ;;  %v281_v19 = vld [vmem:[#allocation8 + $0x40] sm:$0xff]  ;;  %v283_v21 = vld [vmem:[#allocation8 + $0x50] sm:$0xff] }
  0x4f   :  { %853 = vmatpush1.bf16.msra.mxu0 %v852_v9  ;;  %v886_v18 = vpack.c.bf16 %v288_v16, %v284_v15  ;;  %v285_v20 = vld [vmem:[#allocation8 + $0x60] sm:$0xff]  ;;  %v287_v23 = vld [vmem:[#allocation8 + $0x70] sm:$0xff]  ;;  %v290_v24 = vld [vmem:[#allocation8 + $0x88] sm:$0xff]  ;;  %p1235_p7 = por %p1234_p6, %p1233_p5 }
  0x50   :  { %885 = vmatpush1.bf16.msra.mxu1 %v884_v13  ;;  %v856_v22 = vpack.c.bf16 %v285_v20, %v281_v19  ;;  %v294_v25 = vld [vmem:[#allocation8 + $0xa8] sm:$0xff]  ;;  %855 = vmatprep.subr.bf16.mxu0 %v854_v17  ;;  %v888_v26 = vpack.c.bf16 %v287_v23, %v283_v21  ;;  %v292_v28 = vld [vmem:[#allocation8 + $0x98] sm:$0xff]  ;;  %v289_v30 = vld [vmem:[#allocation8 + $0x80] sm:$0xff] }
  0x51   :  { %887 = vmatprep.subr.bf16.mxu1 %v886_v18  ;;  %v858_v27 = vpack.c.bf16 %v294_v25, %v290_v24  ;;  %v296_v29 = vld [vmem:[#allocation8 + $0xb8] sm:$0xff]  ;;  %v293_v32 = vld [vmem:[#allocation8 + $0xa0] sm:$0xff]  ;;  %v291_v33 = vld [vmem:[#allocation8 + $0x90] sm:$0xff]  ;;  %p1236_p8 = pnand %p1235_p7, %p1229_p4 }
  0x52   :  { %v890_v31 = vpack.c.bf16 %v296_v29, %v292_v28  ;;  %v295_v34 = vld [vmem:[#allocation8 + $0xb0] sm:$0xff]  ;;  %v860_v35 = vpack.c.bf16 %v293_v32, %v289_v30  ;;  %v298_v36 = vld [vmem:[#allocation8 + $0xc8] sm:$0xff]  ;;  %v300_v38 = vld [vmem:[#allocation8 + $0xd8] sm:$0xff] }
  0x53   :  { %857 = vmatpush1.bf16.msra.mxu0 %v856_v22  ;;  %v302_v37 = vld [vmem:[#allocation8 + $0xe8] sm:$0xff]  ;;  %v892_v39 = vpack.c.bf16 %v295_v34, %v291_v33  ;;  %v304_v41 = vld [vmem:[#allocation8 + $0xf8] sm:$0xff]  ;;  %v297_v42 = vld [vmem:[#allocation8 + $0xc0] sm:$0xff] }
  0x54   :  { %889 = vmatpush1.bf16.msra.mxu1 %v888_v26  ;;  %859 = vmatprep.subr.bf16.mxu0 %v858_v27  ;;  %v862_v40 = vpack.c.bf16 %v302_v37, %v298_v36  ;;  %v301_v43 = vld [vmem:[#allocation8 + $0xe0] sm:$0xff]  ;;  %v894_v44 = vpack.c.bf16 %v304_v41, %v300_v38  ;;  %v299_v45 = vld [vmem:[#allocation8 + $0xd0] sm:$0xff]  ;;  %v306_v47 = vld [vmem:[#allocation8 + $0x108] sm:$0xff] }
  0x55   :  { %891 = vmatprep.subr.bf16.mxu1 %v890_v31  ;;  %v303_v46 = vld [vmem:[#allocation8 + $0xf0] sm:$0xff]  ;;  %v310_v48 = vld [vmem:[#allocation8 + $0x128] sm:$0xff]  ;;  %v308_v49 = vld [vmem:[#allocation8 + $0x118] sm:$0xff]  ;;  %v864_v51 = vpack.c.bf16 %v301_v43, %v297_v42 }
  0x56   :  { %v312_v50 = vld [vmem:[#allocation8 + $0x138] sm:$0xff]  ;;  %v896_v52 = vpack.c.bf16 %v303_v46, %v299_v45  ;;  %v866_v53 = vpack.c.bf16 %v310_v48, %v306_v47  ;;  %v305_v54 = vld [vmem:[#allocation8 + $0x100] sm:$0xff]  ;;  %v307_v56 = vld [vmem:[#allocation8 + $0x110] sm:$0xff] }
  0x57   :  { %861 = vmatpush1.bf16.msra.mxu0 %v860_v35  ;;  %v309_v55 = vld [vmem:[#allocation8 + $0x120] sm:$0xff]  ;;  %v898_v57 = vpack.c.bf16 %v312_v50, %v308_v49  ;;  %v311_v58 = vld [vmem:[#allocation8 + $0x130] sm:$0xff]  ;;  %v314_v59 = vld [vmem:[#allocation8 + $0x148] sm:$0xff] }
  0x58   :  { %893 = vmatpush1.bf16.msra.mxu1 %v892_v39  ;;  %863 = vmatprep.subr.bf16.mxu0 %v862_v40  ;;  %v318_v60 = vld [vmem:[#allocation8 + $0x168] sm:$0xff]  ;;  %v316_v61 = vld [vmem:[#allocation8 + $0x158] sm:$0xff]  ;;  %v868_v63 = vpack.c.bf16 %v309_v55, %v305_v54  ;;  %v900_v1 = vpack.c.bf16 %v311_v58, %v307_v56  ;;  %v313_v3 = vld [vmem:[#allocation8 + $0x140] sm:$0xff] }
  0x59   :  { %895 = vmatprep.subr.bf16.mxu1 %v894_v44  ;;  %v320_v62 = vld [vmem:[#allocation8 + $0x178] sm:$0xff]  ;;  %v870_v2 = vpack.c.bf16 %v318_v60, %v314_v59  ;;  %v317_v4 = vld [vmem:[#allocation8 + $0x160] sm:$0xff]  ;;  %v315_v5 = vld [vmem:[#allocation8 + $0x150] sm:$0xff] }
  0x5a   :  { %v902_v6 = vpack.c.bf16 %v320_v62, %v316_v61  ;;  %v319_v7 = vld [vmem:[#allocation8 + $0x170] sm:$0xff]  ;;  %v322_v8 = vld [vmem:[#allocation8 + $0x188] sm:$0xff]  ;;  %v324_v10 = vld [vmem:[#allocation8 + $0x198] sm:$0xff]  ;;  %v872_v12 = vpack.c.bf16 %v317_v4, %v313_v3 }
  0x5b   :  { %865 = vmatpush1.bf16.msra.mxu0 %v864_v51  ;;  %v326_v9 = vld [vmem:[#allocation8 + $0x1a8] sm:$0xff]  ;;  %v328_v11 = vld [vmem:[#allocation8 + $0x1b8] sm:$0xff]  ;;  %v904_v13 = vpack.c.bf16 %v319_v7, %v315_v5  ;;  %v321_v15 = vld [vmem:[#allocation8 + $0x180] sm:$0xff] }
  0x5c   :  { %897 = vmatpush1.bf16.msra.mxu1 %v896_v52  ;;  %867 = vmatprep.subr.bf16.mxu0 %v866_v53  ;;  %v874_v14 = vpack.c.bf16 %v326_v9, %v322_v8  ;;  %v325_v16 = vld [vmem:[#allocation8 + $0x1a0] sm:$0xff]  ;;  %v323_v17 = vld [vmem:[#allocation8 + $0x190] sm:$0xff]  ;;  %v906_v18 = vpack.c.bf16 %v328_v11, %v324_v10  ;;  %v330_v20 = vld [vmem:[#allocation8 + $0x1c8] sm:$0xff] }
  0x5d   :  { %899 = vmatprep.subr.bf16.mxu1 %v898_v57  ;;  %v327_v19 = vld [vmem:[#allocation8 + $0x1b0] sm:$0xff]  ;;  %v334_v21 = vld [vmem:[#allocation8 + $0x1e8] sm:$0xff]  ;;  %v332_v22 = vld [vmem:[#allocation8 + $0x1d8] sm:$0xff]  ;;  %v876_v24 = vpack.c.bf16 %v325_v16, %v321_v15 }
  0x5e   :  { %v336_v23 = vld [vmem:[#allocation8 + $0x1f8] sm:$0xff]  ;;  %v908_v25 = vpack.c.bf16 %v327_v19, %v323_v17  ;;  %v878_v26 = vpack.c.bf16 %v334_v21, %v330_v20  ;;  %v329_v27 = vld [vmem:[#allocation8 + $0x1c0] sm:$0xff]  ;;  %v331_v29 = vld [vmem:[#allocation8 + $0x1d0] sm:$0xff] }
  0x5f   :  { %869 = vmatpush1.bf16.msra.mxu0 %v868_v63  ;;  %v333_v28 = vld [vmem:[#allocation8 + $0x1e0] sm:$0xff]  ;;  %v910_v30 = vpack.c.bf16 %v336_v23, %v332_v22  ;;  %v335_v31 = vld [vmem:[#allocation8 + $0x1f0] sm:$0xff]  ;;  %v81_v32 = vld [vmem:[#allocation7 + $0x8] sm:$0xff] }
  0x60   :  { %901 = vmatpush1.bf16.msra.mxu1 %v900_v1  ;;  %871 = vmatprep.subr.bf16.mxu0 %v870_v2  ;;  %v85_v33 = vld [vmem:[#allocation7 + $0x28] sm:$0xff]  ;;  %v83_v34 = vld [vmem:[#allocation7 + $0x18] sm:$0xff]  ;;  %v880_v36 = vpack.c.bf16 %v333_v28, %v329_v27  ;;  %v912_v37 = vpack.c.bf16 %v335_v31, %v331_v29  ;;  %v80_v39 = vld [vmem:[#allocation7] sm:$0xff] }
  0x61   :  { %903 = vmatprep.subr.bf16.mxu1 %v902_v6  ;;  %v87_v35 = vld [vmem:[#allocation7 + $0x38] sm:$0xff]  ;;  %v914_v38 = vpack.c.bf16 %v85_v33, %v81_v32  ;;  %v84_v40 = vld [vmem:[#allocation7 + $0x20] sm:$0xff]  ;;  %v82_v41 = vld [vmem:[#allocation7 + $0x10] sm:$0xff] }
  0x62   :  { %v1010_v42 = vpack.c.bf16 %v87_v35, %v83_v34  ;;  %v86_v43 = vld [vmem:[#allocation7 + $0x30] sm:$0xff]  ;;  %v89_v44 = vld [vmem:[#allocation7 + $0x48] sm:$0xff]  ;;  %v91_v46 = vld [vmem:[#allocation7 + $0x58] sm:$0xff]  ;;  %v916_v49 = vpack.c.bf16 %v84_v40, %v80_v39 }
  0x63   :  { %873 = vmatpush1.bf16.msra.mxu0 %v872_v12  ;;  %v93_v45 = vld [vmem:[#allocation7 + $0x68] sm:$0xff]  ;;  %v95_v47 = vld [vmem:[#allocation7 + $0x78] sm:$0xff]  ;;  %v1012_v50 = vpack.c.bf16 %v86_v43, %v82_v41  ;;  %v88_v52 = vld [vmem:[#allocation7 + $0x40] sm:$0xff] }
  0x64   :  { %905 = vmatpush1.bf16.msra.mxu1 %v904_v13  ;;  %875 = vmatprep.subr.bf16.mxu0 %v874_v14  ;;  %v272_v48 = vld [vmem:[#allocation5] sm:$0xf]  ;;  %v918_v51 = vpack.c.bf16 %v93_v45, %v89_v44  ;;  %v92_v53 = vld [vmem:[#allocation7 + $0x60] sm:$0xff]  ;;  %v90_v54 = vld [vmem:[#allocation7 + $0x50] sm:$0xff]  ;;  %v1014_v55 = vpack.c.bf16 %v95_v47, %v91_v46 }
  0x65   :  { %907 = vmatprep.subr.bf16.mxu1 %v906_v18  ;;  %v94_v56 = vld [vmem:[#allocation7 + $0x70] sm:$0xff]  ;;  %v97_v57 = vld [vmem:[#allocation7 + $0x88] sm:$0xff]  ;;  %v99_v59 = vld [vmem:[#allocation7 + $0x98] sm:$0xff]  ;;  %v920_v61 = vpack.c.bf16 %v92_v53, %v88_v52 }
  0x66   :  { %v101_v58 = vld [vmem:[#allocation7 + $0xa8] sm:$0xff]  ;;  %v103_v60 = vld [vmem:[#allocation7 + $0xb8] sm:$0xff]  ;;  %v1016_v62 = vpack.c.bf16 %v94_v56, %v90_v54  ;;  %v96_v1 = vld [vmem:[#allocation7 + $0x80] sm:$0xff] }
  0x67   :  { %877 = vmatpush1.bf16.msra.mxu0 %v876_v24  ;;  %v922_v63 = vpack.c.bf16 %v101_v58, %v97_v57  ;;  %v100_v2 = vld [vmem:[#allocation7 + $0xa0] sm:$0xff]  ;;  %v98_v3 = vld [vmem:[#allocation7 + $0x90] sm:$0xff]  ;;  %v1018_v4 = vpack.c.bf16 %v103_v60, %v99_v59  ;;  %v105_v6 = vld [vmem:[#allocation7 + $0xc8] sm:$0xff] }
  0x68   :  { %909 = vmatpush1.bf16.msra.mxu1 %v908_v25  ;;  %879 = vmatprep.subr.bf16.mxu0 %v878_v26  ;;  %v102_v5 = vld [vmem:[#allocation7 + $0xb0] sm:$0xff]  ;;  %v109_v7 = vld [vmem:[#allocation7 + $0xe8] sm:$0xff]  ;;  %v107_v8 = vld [vmem:[#allocation7 + $0xd8] sm:$0xff]  ;;  %v924_v10 = vpack.c.bf16 %v100_v2, %v96_v1 }
  0x69   :  { %911 = vmatprep.subr.bf16.mxu1 %v910_v30  ;;  %v111_v9 = vld [vmem:[#allocation7 + $0xf8] sm:$0xff]  ;;  %v1020_v11 = vpack.c.bf16 %v102_v5, %v98_v3  ;;  %v926_v12 = vpack.c.bf16 %v109_v7, %v105_v6  ;;  %v104_v13 = vld [vmem:[#allocation7 + $0xc0] sm:$0xff]  ;;  %v106_v15 = vld [vmem:[#allocation7 + $0xd0] sm:$0xff] }
  0x6a   :  { %v108_v14 = vld [vmem:[#allocation7 + $0xe0] sm:$0xff]  ;;  %v1022_v16 = vpack.c.bf16 %v111_v9, %v107_v8  ;;  %v110_v17 = vld [vmem:[#allocation7 + $0xf0] sm:$0xff]  ;;  %v113_v18 = vld [vmem:[#allocation7 + $0x108] sm:$0xff] }
  0x6b   :  { %881 = vmatpush1.bf16.msra.mxu0 %v880_v36  ;;  %v117_v19 = vld [vmem:[#allocation7 + $0x128] sm:$0xff]  ;;  %v115_v20 = vld [vmem:[#allocation7 + $0x118] sm:$0xff]  ;;  %v928_v22 = vpack.c.bf16 %v108_v14, %v104_v13  ;;  %v1024_v23 = vpack.c.bf16 %v110_v17, %v106_v15  ;;  %v112_v25 = vld [vmem:[#allocation7 + $0x100] sm:$0xff] }
  0x6c   :  { %913 = vmatpush1.bf16.msra.mxu1 %v912_v37  ;;  %915 = vmatprep.subr.bf16.mxu0 %v914_v38  ;;  %v119_v21 = vld [vmem:[#allocation7 + $0x138] sm:$0xff]  ;;  %v930_v24 = vpack.c.bf16 %v117_v19, %v113_v18  ;;  %v116_v26 = vld [vmem:[#allocation7 + $0x120] sm:$0xff]  ;;  %v114_v27 = vld [vmem:[#allocation7 + $0x110] sm:$0xff] }
  0x6d   :  { %1011 = vmatprep.subr.bf16.mxu1 %v1010_v42  ;;  %v1026_v28 = vpack.c.bf16 %v119_v21, %v115_v20  ;;  %v118_v29 = vld [vmem:[#allocation7 + $0x130] sm:$0xff]  ;;  %v121_v30 = vld [vmem:[#allocation7 + $0x148] sm:$0xff]  ;;  %v123_v32 = vld [vmem:[#allocation7 + $0x158] sm:$0xff]  ;;  %v932_v34 = vpack.c.bf16 %v116_v26, %v112_v25 }
  0x6e   :  { %402 = vmatmul.mubr.f32.vlgmr.msra.gmra.mrb[0].mxu0 %v272_v48  ;;  %v125_v31 = vld [vmem:[#allocation7 + $0x168] sm:$0xff]  ;;  %v127_v33 = vld [vmem:[#allocation7 + $0x178] sm:$0xff]  ;;  %v1028_v35 = vpack.c.bf16 %v118_v29, %v114_v27  ;;  %v120_v37 = vld [vmem:[#allocation7 + $0x140] sm:$0xff] }
  0x6f   :  { %473 = vmatmul.mubr.f32.vlgmr.msra.gmra.mrb[0].mxu1 %v272_v48  ;;  %917 = vmatpush1.bf16.msra.mxu0 %v916_v49  ;;  %v934_v36 = vpack.c.bf16 %v125_v31, %v121_v30  ;;  %v124_v38 = vld [vmem:[#allocation7 + $0x160] sm:$0xff]  ;;  %v122_v39 = vld [vmem:[#allocation7 + $0x150] sm:$0xff]  ;;  %v1030_v40 = vpack.c.bf16 %v127_v33, %v123_v32  ;;  %v129_v42 = vld [vmem:[#allocation7 + $0x188] sm:$0xff] }
  0x70   :  { %1013 = vmatpush1.bf16.msra.mxu1 %v1012_v50  ;;  %919 = vmatprep.subr.bf16.mxu0 %v918_v51  ;;  %v126_v41 = vld [vmem:[#allocation7 + $0x170] sm:$0xff]  ;;  %v133_v43 = vld [vmem:[#allocation7 + $0x1a8] sm:$0xff]  ;;  %v131_v44 = vld [vmem:[#allocation7 + $0x198] sm:$0xff]  ;;  %v936_v46 = vpack.c.bf16 %v124_v38, %v120_v37 }
  0x71   :  { %1015 = vmatprep.subr.bf16.mxu1 %v1014_v55  ;;  %v135_v45 = vld [vmem:[#allocation7 + $0x1b8] sm:$0xff]  ;;  %v1032_v47 = vpack.c.bf16 %v126_v41, %v122_v39  ;;  %v938_v48 = vpack.c.bf16 %v133_v43, %v129_v42  ;;  %v128_v49 = vld [vmem:[#allocation7 + $0x180] sm:$0xff]  ;;  %v130_v51 = vld [vmem:[#allocation7 + $0x190] sm:$0xff] }
  0x72   :  { %v132_v50 = vld [vmem:[#allocation7 + $0x1a0] sm:$0xff]  ;;  %v1034_v52 = vpack.c.bf16 %v135_v45, %v131_v44  ;;  %v134_v53 = vld [vmem:[#allocation7 + $0x1b0] sm:$0xff]  ;;  %v137_v54 = vld [vmem:[#allocation7 + $0x1c8] sm:$0xff] }
  0x73   :  { %921 = vmatpush1.bf16.msra.mxu0 %v920_v61  ;;  %v141_v55 = vld [vmem:[#allocation7 + $0x1e8] sm:$0xff]  ;;  %v139_v56 = vld [vmem:[#allocation7 + $0x1d8] sm:$0xff]  ;;  %v940_v58 = vpack.c.bf16 %v132_v50, %v128_v49  ;;  %v1036_v59 = vpack.c.bf16 %v134_v53, %v130_v51  ;;  %v136_v61 = vld [vmem:[#allocation7 + $0x1c0] sm:$0xff] }
  0x74   :  { %1017 = vmatpush1.bf16.msra.mxu1 %v1016_v62  ;;  %923 = vmatprep.subr.bf16.mxu0 %v922_v63  ;;  %v143_v57 = vld [vmem:[#allocation7 + $0x1f8] sm:$0xff]  ;;  %v942_v60 = vpack.c.bf16 %v141_v55, %v137_v54  ;;  %v140_v62 = vld [vmem:[#allocation7 + $0x1e0] sm:$0xff]  ;;  %v138_v63 = vld [vmem:[#allocation7 + $0x1d0] sm:$0xff] }
  0x75   :  { %1019 = vmatprep.subr.bf16.mxu1 %v1018_v4  ;;  %v1038_v1 = vpack.c.bf16 %v143_v57, %v139_v56  ;;  %v142_v2 = vld [vmem:[#allocation7 + $0x1f0] sm:$0xff]  ;;  %v145_v3 = vld [vmem:[#allocation7 + $0x208] sm:$0xff]  ;;  %v147_v5 = vld [vmem:[#allocation7 + $0x218] sm:$0xff]  ;;  %v944_v7 = vpack.c.bf16 %v140_v62, %v136_v61 }
  0x76   :  { %v149_v4 = vld [vmem:[#allocation7 + $0x228] sm:$0xff]  ;;  %v151_v6 = vld [vmem:[#allocation7 + $0x238] sm:$0xff]  ;;  %v1040_v8 = vpack.c.bf16 %v142_v2, %v138_v63  ;;  %v150_v14 = vld [vmem:[#allocation7 + $0x230] sm:$0xff] }
  0x77   :  { %925 = vmatpush1.bf16.msra.mxu0 %v924_v10  ;;  %v946_v9 = vpack.c.bf16 %v149_v4, %v145_v3  ;;  %v144_v10 = vld [vmem:[#allocation7 + $0x200] sm:$0xff]  ;;  %v1042_v13 = vpack.c.bf16 %v151_v6, %v147_v5  ;;  %v153_v15 = vld [vmem:[#allocation7 + $0x248] sm:$0xff]  ;;  %v155_v17 = vld [vmem:[#allocation7 + $0x258] sm:$0xff] }
  0x78   :  { %1021 = vmatpush1.bf16.msra.mxu1 %v1020_v11  ;;  %927 = vmatprep.subr.bf16.mxu0 %v926_v12  ;;  %v148_v11 = vld [vmem:[#allocation7 + $0x220] sm:$0xff]  ;;  %v146_v12 = vld [vmem:[#allocation7 + $0x210] sm:$0xff]  ;;  %v159_v18 = vld [vmem:[#allocation7 + $0x278] sm:$0xff] }
  0x79   :  { %1023 = vmatprep.subr.bf16.mxu1 %v1022_v16  ;;  %v157_v16 = vld [vmem:[#allocation7 + $0x268] sm:$0xff]  ;;  %v948_v19 = vpack.c.bf16 %v148_v11, %v144_v10  ;;  %v1381_v20 = vld [vmem:[#allocation2] sm:$0xff]  ;;  %v1044_v21 = vpack.c.bf16 %v150_v14, %v146_v12  ;;  %v1046_v27 = vpack.c.bf16 %v159_v18, %v155_v17  ;;  %v163_v31 = vld [vmem:[#allocation7 + $0x298] sm:$0xff] }
  0x7a   :  { %v154_v25 = vld [vmem:[#allocation7 + $0x250] sm:$0xff]  ;;  %v480_v26 = vcombine.high %v1381_v20, %v1381_v20  ;;  %v161_v29 = vld [vmem:[#allocation7 + $0x288] sm:$0xff]  ;;  %v167_v32 = vld [vmem:[#allocation7 + $0x2b8] sm:$0xff] }
  0x7b   :  { %929 = vmatpush1.bf16.msra.mxu0 %v928_v22  ;;  %v950_v22 = vpack.c.bf16 %v157_v16, %v153_v15  ;;  %v165_v30 = vld [vmem:[#allocation7 + $0x2a8] sm:$0xff]  ;;  %v164_v37 = vld [vmem:[#allocation7 + $0x2a0] sm:$0xff]  ;;  %v162_v38 = vld [vmem:[#allocation7 + $0x290] sm:$0xff]  ;;  %v1050_v39 = vpack.c.bf16 %v167_v32, %v163_v31 }
  0x7c   :  { %1025 = vmatpush1.bf16.msra.mxu1 %v1024_v23  ;;  %931 = vmatprep.subr.bf16.mxu0 %v930_v24  ;;  %v152_v23 = vld [vmem:[#allocation7 + $0x240] sm:$0xff]  ;;  %v169_v41 = vld [vmem:[#allocation7 + $0x2c8] sm:$0xff]  ;;  %v171_v43 = vld [vmem:[#allocation7 + $0x2d8] sm:$0xff] }
  0x7d   :  { %1027 = vmatprep.subr.bf16.mxu1 %v1026_v28  ;;  %v156_v24 = vld [vmem:[#allocation7 + $0x260] sm:$0xff]  ;;  %v158_v28 = vld [vmem:[#allocation7 + $0x270] sm:$0xff]  ;;  %546 = vmatprep.mubr.f32.mxu0 %v480_v26  ;;  %v173_v42 = vld [vmem:[#allocation7 + $0x2e8] sm:$0xff] }
  0x7e   :  { %688 = vmatprep.mubr.f32.mxu1 %v480_v26  ;;  %v952_v33 = vpack.c.bf16 %v156_v24, %v152_v23  ;;  %v175_v44 = vld [vmem:[#allocation7 + $0x2f8] sm:$0xff]  ;;  %v172_v49 = vld [vmem:[#allocation7 + $0x2e0] sm:$0xff]  ;;  %v170_v50 = vld [vmem:[#allocation7 + $0x2d0] sm:$0xff] }
  0x7f   :  { %933 = vmatpush1.bf16.msra.mxu0 %v932_v34  ;;  %v1048_v34 = vpack.c.bf16 %v158_v28, %v154_v25  ;;  %v1054_v51 = vpack.c.bf16 %v175_v44, %v171_v43  ;;  %v177_v53 = vld [vmem:[#allocation7 + $0x308] sm:$0xff]  ;;  %v179_v55 = vld [vmem:[#allocation7 + $0x318] sm:$0xff]  ;;  %v180_v61 = vld [vmem:[#allocation7 + $0x320] sm:$0xff] }
  0x80   :  { %1029 = vmatpush1.bf16.msra.mxu1 %v1028_v35  ;;  %935 = vmatprep.subr.bf16.mxu0 %v934_v36  ;;  %v954_v35 = vpack.c.bf16 %v165_v30, %v161_v29  ;;  %v160_v36 = vld [vmem:[#allocation7 + $0x280] sm:$0xff]  ;;  %v181_v54 = vld [vmem:[#allocation7 + $0x328] sm:$0xff]  ;;  %v183_v56 = vld [vmem:[#allocation7 + $0x338] sm:$0xff] }
  0x81   :  { %1031 = vmatprep.subr.bf16.mxu1 %v1030_v40  ;;  %v166_v40 = vld [vmem:[#allocation7 + $0x2b0] sm:$0xff]  ;;  %v956_v45 = vpack.c.bf16 %v164_v37, %v160_v36  ;;  %v1058_v63 = vpack.c.bf16 %v183_v56, %v179_v55  ;;  %v185_v2 = vld [vmem:[#allocation7 + $0x348] sm:$0xff]  ;;  %v187_v4 = vld [vmem:[#allocation7 + $0x358] sm:$0xff] }
  0x82   :  { %v178_v62 = vld [vmem:[#allocation7 + $0x310] sm:$0xff]  ;;  %v189_v3 = vld [vmem:[#allocation7 + $0x368] sm:$0xff]  ;;  %v191_v5 = vld [vmem:[#allocation7 + $0x378] sm:$0xff] }
  0x83   :  { %937 = vmatpush1.bf16.msra.mxu0 %v936_v46  ;;  %v1052_v46 = vpack.c.bf16 %v166_v40, %v162_v38  ;;  %v188_v10 = vld [vmem:[#allocation7 + $0x360] sm:$0xff]  ;;  %v186_v11 = vld [vmem:[#allocation7 + $0x350] sm:$0xff]  ;;  %v1062_v12 = vpack.c.bf16 %v191_v5, %v187_v4  ;;  %v193_v14 = vld [vmem:[#allocation7 + $0x388] sm:$0xff] }
  0x84   :  { %1033 = vmatpush1.bf16.msra.mxu1 %v1032_v47  ;;  %939 = vmatprep.subr.bf16.mxu0 %v938_v48  ;;  %v958_v47 = vpack.c.bf16 %v173_v42, %v169_v41  ;;  %v168_v48 = vld [vmem:[#allocation7 + $0x2c0] sm:$0xff]  ;;  %v197_v15 = vld [vmem:[#allocation7 + $0x3a8] sm:$0xff]  ;;  %v195_v16 = vld [vmem:[#allocation7 + $0x398] sm:$0xff] }
  0x85   :  { %1035 = vmatprep.subr.bf16.mxu1 %v1034_v52  ;;  %v174_v52 = vld [vmem:[#allocation7 + $0x2f0] sm:$0xff]  ;;  %v960_v57 = vpack.c.bf16 %v172_v49, %v168_v48  ;;  %v199_v17 = vld [vmem:[#allocation7 + $0x3b8] sm:$0xff]  ;;  %v196_v23 = vld [vmem:[#allocation7 + $0x3a0] sm:$0xff] }
  0x86   :  { %v194_v24 = vld [vmem:[#allocation7 + $0x390] sm:$0xff]  ;;  %v1066_v25 = vpack.c.bf16 %v199_v17, %v195_v16  ;;  %v205_v28 = vld [vmem:[#allocation7 + $0x3e8] sm:$0xff]  ;;  %v203_v29 = vld [vmem:[#allocation7 + $0x3d8] sm:$0xff] }
  0x87   :  { %941 = vmatpush1.bf16.msra.mxu0 %v940_v58  ;;  %v1056_v58 = vpack.c.bf16 %v174_v52, %v170_v50  ;;  %v198_v26 = vld [vmem:[#allocation7 + $0x3b0] sm:$0xff]  ;;  %v207_v30 = vld [vmem:[#allocation7 + $0x3f8] sm:$0xff]  ;;  %v213_v40 = vld [vmem:[#allocation7 + $0x428] sm:$0xff] }
  0x88   :  { %1037 = vmatpush1.bf16.msra.mxu1 %v1036_v59  ;;  %943 = vmatprep.subr.bf16.mxu0 %v942_v60  ;;  %v962_v59 = vpack.c.bf16 %v181_v54, %v177_v53  ;;  %v176_v60 = vld [vmem:[#allocation7 + $0x300] sm:$0xff]  ;;  %v1068_v32 = vpack.c.bf16 %v198_v26, %v194_v24  ;;  %v202_v36 = vld [vmem:[#allocation7 + $0x3d0] sm:$0xff]  ;;  %v1070_v37 = vpack.c.bf16 %v207_v30, %v203_v29  ;;  %v211_v41 = vld [vmem:[#allocation7 + $0x418] sm:$0xff] }
  0x89   :  { %1039 = vmatprep.subr.bf16.mxu1 %v1038_v1  ;;  %v182_v1 = vld [vmem:[#allocation7 + $0x330] sm:$0xff]  ;;  %v964_v6 = vpack.c.bf16 %v180_v61, %v176_v60  ;;  %v215_v42 = vld [vmem:[#allocation7 + $0x438] sm:$0xff]  ;;  %v221_v52 = vld [vmem:[#allocation7 + $0x468] sm:$0xff] }
  0x8a   :  { %v206_v38 = vld [vmem:[#allocation7 + $0x3f0] sm:$0xff]  ;;  %v1074_v49 = vpack.c.bf16 %v215_v42, %v211_v41  ;;  %v219_v53 = vld [vmem:[#allocation7 + $0x458] sm:$0xff]  ;;  %v241_v24 = vld [vmem:[#allocation7 + $0x508] sm:$0xff] }
  0x8b   :  { %945 = vmatpush1.bf16.msra.mxu0 %v944_v7  ;;  %v1060_v7 = vpack.c.bf16 %v182_v1, %v178_v62  ;;  %v1072_v44 = vpack.c.bf16 %v206_v38, %v202_v36  ;;  %v210_v48 = vld [vmem:[#allocation7 + $0x410] sm:$0xff]  ;;  %v223_v54 = vld [vmem:[#allocation7 + $0x478] sm:$0xff]  ;;  %v229_v1 = vld [vmem:[#allocation7 + $0x4a8] sm:$0xff] }
  0x8c   :  { %1041 = vmatpush1.bf16.msra.mxu1 %v1040_v8  ;;  %947 = vmatprep.subr.bf16.mxu0 %v946_v9  ;;  %v966_v8 = vpack.c.bf16 %v189_v3, %v185_v2  ;;  %v184_v9 = vld [vmem:[#allocation7 + $0x340] sm:$0xff]  ;;  %v214_v50 = vld [vmem:[#allocation7 + $0x430] sm:$0xff]  ;;  %v1078_v61 = vpack.c.bf16 %v223_v54, %v219_v53  ;;  %v227_v2 = vld [vmem:[#allocation7 + $0x498] sm:$0xff] }
  0x8d   :  { %1043 = vmatprep.subr.bf16.mxu1 %v1042_v13  ;;  %v190_v13 = vld [vmem:[#allocation7 + $0x370] sm:$0xff]  ;;  %v968_v18 = vpack.c.bf16 %v188_v10, %v184_v9  ;;  %v1076_v56 = vpack.c.bf16 %v214_v50, %v210_v48  ;;  %v231_v3 = vld [vmem:[#allocation7 + $0x4b8] sm:$0xff]  ;;  %v240_v30 = vld [vmem:[#allocation7 + $0x500] sm:$0xff] }
  0x8e   :  { %v218_v60 = vld [vmem:[#allocation7 + $0x450] sm:$0xff]  ;;  %v1082_v10 = vpack.c.bf16 %v231_v3, %v227_v2  ;;  %v243_v26 = vld [vmem:[#allocation7 + $0x518] sm:$0xff]  ;;  %v253_v36 = vld [vmem:[#allocation7 + $0x568] sm:$0xff] }
  0x8f   :  { %949 = vmatpush1.bf16.msra.mxu0 %v948_v19  ;;  %v1064_v19 = vpack.c.bf16 %v190_v13, %v186_v11  ;;  %v222_v62 = vld [vmem:[#allocation7 + $0x470] sm:$0xff]  ;;  %v237_v13 = vld [vmem:[#allocation7 + $0x4e8] sm:$0xff]  ;;  %v255_v38 = vld [vmem:[#allocation7 + $0x578] sm:$0xff] }
  0x90   :  { %1045 = vmatpush1.bf16.msra.mxu1 %v1044_v21  ;;  %951 = vmatprep.subr.bf16.mxu0 %v950_v22  ;;  %v970_v21 = vpack.c.bf16 %v197_v15, %v193_v14  ;;  %v192_v22 = vld [vmem:[#allocation7 + $0x380] sm:$0xff]  ;;  %v1080_v5 = vpack.c.bf16 %v222_v62, %v218_v60  ;;  %v226_v9 = vld [vmem:[#allocation7 + $0x490] sm:$0xff]  ;;  %v235_v14 = vld [vmem:[#allocation7 + $0x4d8] sm:$0xff] }
  0x91   :  { %1047 = vmatprep.subr.bf16.mxu1 %v1046_v27  ;;  %v201_v27 = vld [vmem:[#allocation7 + $0x3c8] sm:$0xff]  ;;  %v972_v31 = vpack.c.bf16 %v196_v23, %v192_v22  ;;  %v230_v11 = vld [vmem:[#allocation7 + $0x4b0] sm:$0xff]  ;;  %v239_v15 = vld [vmem:[#allocation7 + $0x4f8] sm:$0xff] }
  0x92   :  { %v1084_v16 = vpack.c.bf16 %v230_v11, %v226_v9  ;;  %v1086_v22 = vpack.c.bf16 %v239_v15, %v235_v14  ;;  %v238_v23 = vld [vmem:[#allocation7 + $0x4f0] sm:$0xff]  ;;  %v248_v42 = vld [vmem:[#allocation7 + $0x540] sm:$0xff]  ;;  %v261_v48 = vld [vmem:[#allocation7 + $0x5a8] sm:$0xff]  ;;  %v768_v11 = vlaneseq }
  0x93   :  { %953 = vmatpush1.bf16.msra.mxu0 %v952_v33  ;;  %v974_v33 = vpack.c.bf16 %v205_v28, %v201_v27  ;;  %v247_v27 = vld [vmem:[#allocation7 + $0x538] sm:$0xff]  ;;  %v256_v54 = vld [vmem:[#allocation7 + $0x580] sm:$0xff]  ;;  %v269_v60 = vld [vmem:[#allocation7 + $0x5e8] sm:$0xff] }
  0x94   :  { %1049 = vmatpush1.bf16.msra.mxu1 %v1048_v34  ;;  %955 = vmatprep.subr.bf16.mxu0 %v954_v35  ;;  %v200_v34 = vld [vmem:[#allocation7 + $0x3c0] sm:$0xff]  ;;  %v263_v50 = vld [vmem:[#allocation7 + $0x5b8] sm:$0xff]  ;;  %v766_v14 = vld [vmem:[%s1424_s5] sm:$0xf] }
  0x95   :  { %1051 = vmatprep.subr.bf16.mxu1 %v1050_v39  ;;  %v204_v35 = vld [vmem:[#allocation7 + $0x3e0] sm:$0xff]  ;;  %v209_v39 = vld [vmem:[#allocation7 + $0x408] sm:$0xff]  ;;  %v271_v62 = vld [vmem:[#allocation7 + $0x5f8] sm:$0xff] }
  0x96   :  { %v976_v43 = vpack.c.bf16 %v204_v35, %v200_v34  ;;  %v246_v34 = vld [vmem:[#allocation7 + $0x530] sm:$0xff]  ;;  %v249_v35 = vld [vmem:[#allocation7 + $0x548] sm:$0xff]  ;;  %v264_v3 = vld [vmem:[#allocation7 + $0x5c0] sm:$0xff] }
  0x97   :  { %957 = vmatpush1.bf16.msra.mxu0 %v956_v45  ;;  %v978_v45 = vpack.c.bf16 %v213_v40, %v209_v39  ;;  %v998_v41 = vpack.c.bf16 %v253_v36, %v249_v35 }
  0x98   :  { %1053 = vmatpush1.bf16.msra.mxu1 %v1052_v46  ;;  %959 = vmatprep.subr.bf16.mxu0 %v958_v47  ;;  %v208_v46 = vld [vmem:[#allocation7 + $0x400] sm:$0xff] }
  0x99   :  { %1055 = vmatprep.subr.bf16.mxu1 %v1054_v51  ;;  %v212_v47 = vld [vmem:[#allocation7 + $0x420] sm:$0xff]  ;;  %v217_v51 = vld [vmem:[#allocation7 + $0x448] sm:$0xff] }
  0x9a   :  { %v980_v55 = vpack.c.bf16 %v212_v47, %v208_v46  ;;  %v254_v46 = vld [vmem:[#allocation7 + $0x570] sm:$0xff]  ;;  %v257_v47 = vld [vmem:[#allocation7 + $0x588] sm:$0xff] }
  0x9b   :  { %961 = vmatpush1.bf16.msra.mxu0 %v960_v57  ;;  %v982_v57 = vpack.c.bf16 %v221_v52, %v217_v51  ;;  %v1002_v53 = vpack.c.bf16 %v261_v48, %v257_v47 }
  0x9c   :  { %1057 = vmatpush1.bf16.msra.mxu1 %v1056_v58  ;;  %963 = vmatprep.subr.bf16.mxu0 %v962_v59  ;;  %v216_v58 = vld [vmem:[#allocation7 + $0x440] sm:$0xff] }
  0x9d   :  { %1059 = vmatprep.subr.bf16.mxu1 %v1058_v63  ;;  %v220_v59 = vld [vmem:[#allocation7 + $0x460] sm:$0xff]  ;;  %v225_v63 = vld [vmem:[#allocation7 + $0x488] sm:$0xff] }
  0x9e   :  { %v984_v4 = vpack.c.bf16 %v220_v59, %v216_v58  ;;  %v262_v58 = vld [vmem:[#allocation7 + $0x5b0] sm:$0xff]  ;;  %v265_v59 = vld [vmem:[#allocation7 + $0x5c8] sm:$0xff] }
  0x9f   :  { %965 = vmatpush1.bf16.msra.mxu0 %v964_v6  ;;  %v986_v6 = vpack.c.bf16 %v229_v1, %v225_v63  ;;  %v1006_v2 = vpack.c.bf16 %v269_v60, %v265_v59 }
  0xa0   :  { %1061 = vmatpush1.bf16.msra.mxu1 %v1060_v7  ;;  %967 = vmatprep.subr.bf16.mxu0 %v966_v8  ;;  %v224_v7 = vld [vmem:[#allocation7 + $0x480] sm:$0xff] }
  0xa1   :  { %1063 = vmatprep.subr.bf16.mxu1 %v1062_v12  ;;  %v228_v8 = vld [vmem:[#allocation7 + $0x4a0] sm:$0xff]  ;;  %v233_v12 = vld [vmem:[#allocation7 + $0x4c8] sm:$0xff] }
  0xa2   :  { %v990_v17 = vpack.c.bf16 %v237_v13, %v233_v12  ;;  %v769_v12 = vshrl.u32 %v768_v11, 7 }
  0xa3   :  { %969 = vmatpush1.bf16.msra.mxu0 %v968_v18  ;;  %v232_v18 = vld [vmem:[#allocation7 + $0x4c0] sm:$0xff] }
  0xa4   :  { %1065 = vmatpush1.bf16.msra.mxu1 %v1064_v19  ;;  %971 = vmatprep.subr.bf16.mxu0 %v970_v21  ;;  %v236_v19 = vld [vmem:[#allocation7 + $0x4e0] sm:$0xff]  ;;  %v234_v21 = vld [vmem:[#allocation7 + $0x4d0] sm:$0xff]  ;;  %v770_v13 = vsub.s32 0, %v769_v12  ;;  %v774_v15 = vsub.s32 1, %v769_v12 }
  0xa5   :  { %1067 = vmatprep.subr.bf16.mxu1 %v1066_v25  ;;  %v245_v25 = vld [vmem:[#allocation7 + $0x528] sm:$0xff]  ;;  %v992_v28 = vpack.c.bf16 %v236_v19, %v232_v18 }
  0xa6   :  { %v994_v29 = vpack.c.bf16 %v245_v25, %v241_v24 }
  0xa7   :  { %973 = vmatpush1.bf16.msra.mxu0 %v972_v31  ;;  %v244_v31 = vld [vmem:[#allocation7 + $0x520] sm:$0xff] }
  0xa8   :  { %1069 = vmatpush1.bf16.msra.mxu1 %v1068_v32  ;;  %975 = vmatprep.subr.bf16.mxu0 %v974_v33  ;;  %v242_v32 = vld [vmem:[#allocation7 + $0x510] sm:$0xff]  ;;  %v1090_v33 = vpack.c.bf16 %v247_v27, %v243_v26  ;;  %v996_v39 = vpack.c.bf16 %v244_v31, %v240_v30  ;;  %v778_v30 = vsub.s32 2, %v769_v12 }
  0xa9   :  { %1071 = vmatprep.subr.bf16.mxu1 %v1070_v37  ;;  %v251_v37 = vld [vmem:[#allocation7 + $0x558] sm:$0xff]  ;;  %v1092_v40 = vpack.c.bf16 %v246_v34, %v242_v32 }
  0xaa   :  { %v779_v32 = vrot.slane %v766_v14, %v778_v30 }
  0xab   :  { %977 = vmatpush1.bf16.msra.mxu0 %v976_v43  ;;  %v252_v43 = vld [vmem:[#allocation7 + $0x560] sm:$0xff] }
  0xac   :  { %1073 = vmatpush1.bf16.msra.mxu1 %v1072_v44  ;;  %979 = vmatprep.subr.bf16.mxu0 %v978_v45  ;;  %v250_v44 = vld [vmem:[#allocation7 + $0x550] sm:$0xff]  ;;  %v1094_v45 = vpack.c.bf16 %v255_v38, %v251_v37  ;;  %v1000_v51 = vpack.c.bf16 %v252_v43, %v248_v42 }
  0xad   :  { %1075 = vmatprep.subr.bf16.mxu1 %v1074_v49  ;;  %v259_v49 = vld [vmem:[#allocation7 + $0x598] sm:$0xff]  ;;  %v1096_v52 = vpack.c.bf16 %v254_v46, %v250_v44 }
  0xae   :  { %547 = vmatmul.mubr.f32.vlgmr.msra.gmra.mrb[0].mxu0 %v1381_v20 }
  0xaf   :  { %981 = vmatpush1.bf16.msra.mxu0 %v980_v55  ;;  %689 = vmatmul.mubr.f32.vlgmr.msra.gmra.mrb[0].mxu1 %v1381_v20  ;;  %v988_v20 = vpack.c.bf16 %v228_v8, %v224_v7  ;;  %v260_v55 = vld [vmem:[#allocation7 + $0x5a0] sm:$0xff]  ;;  %v270_v7 = vld [vmem:[#allocation7 + $0x5f0] sm:$0xff] }
  0xb0   :  { %1077 = vmatpush1.bf16.msra.mxu1 %v1076_v56  ;;  %983 = vmatprep.subr.bf16.mxu0 %v982_v57  ;;  %v258_v56 = vld [vmem:[#allocation7 + $0x590] sm:$0xff]  ;;  %v1098_v57 = vpack.c.bf16 %v263_v50, %v259_v49  ;;  %v1004_v63 = vpack.c.bf16 %v260_v55, %v256_v54 }
  0xb1   :  { %1079 = vmatprep.subr.bf16.mxu1 %v1078_v61  ;;  %617 = vmatprep.mubr.f32.mxu0 %v1288_v0  ;;  %v267_v61 = vld [vmem:[#allocation7 + $0x5d8] sm:$0xff]  ;;  %v1100_v1 = vpack.c.bf16 %v262_v58, %v258_v56 }
  0xb2   :  { %759 = vmatprep.mubr.f32.mxu1 %v1288_v0  ;;  %v1088_v0 = vpack.c.bf16 %v238_v23, %v234_v21 }
  0xb3   :  { %985 = vmatpush1.bf16.msra.mxu0 %v984_v4  ;;  %v268_v4 = vld [vmem:[#allocation7 + $0x5e0] sm:$0xff] }
  0xb4   :  { %1081 = vmatpush1.bf16.msra.mxu1 %v1080_v5  ;;  %987 = vmatprep.subr.bf16.mxu0 %v986_v6  ;;  %v1102_v5 = vpack.c.bf16 %v271_v62, %v267_v61  ;;  %v266_v6 = vld [vmem:[#allocation7 + $0x5d0] sm:$0xff]  ;;  %v1008_v8 = vpack.c.bf16 %v268_v4, %v264_v3 }
  0xb5   :  { %1083 = vmatprep.subr.bf16.mxu1 %v1082_v10  ;;  %v1104_v9 = vpack.c.bf16 %v270_v7, %v266_v6  ;;  %v79_v10 = vld [vmem:[#allocation2 + $0x8] sm:$0xf] }
  0xb7   :  { %989 = vmatpush1.bf16.msra.mxu0 %v988_v20  ;;  %v771_v20 = vrot.slane %v766_v14, %v770_v13 }
  0xb8   :  { %1085 = vmatpush1.bf16.msra.mxu1 %v1084_v16  ;;  %991 = vmatprep.subr.bf16.mxu0 %v990_v17  ;;  %v775_v16 = vrot.slane %v766_v14, %v774_v15  ;;  %v782_v17 = vsub.s32 3, %v769_v12 }
  0xb9   :  { %1087 = vmatprep.subr.bf16.mxu1 %v1086_v22 }
  0xba   :  { %v783_v25 = vrot.slane %v766_v14, %v782_v17 }
  0xbb   :  { %993 = vmatpush1.bf16.msra.mxu0 %v992_v28 }
  0xbc   :  { %1089 = vmatpush1.bf16.msra.mxu1 %v1088_v0  ;;  %995 = vmatprep.subr.bf16.mxu0 %v994_v29 }
  0xbd   :  { %1091 = vmatprep.subr.bf16.mxu1 %v1090_v33 }
  0xbf   :  { %997 = vmatpush1.bf16.msra.mxu0 %v996_v39 }
  0xc0   :  { %1093 = vmatpush1.bf16.msra.mxu1 %v1092_v40  ;;  %999 = vmatprep.subr.bf16.mxu0 %v998_v41  ;;  %v811_v41 = vld [vmem:[%s1421_s2] sm:$0xf] }
  0xc1   :  { %1095 = vmatprep.subr.bf16.mxu1 %v1094_v45 }
  0xc3   :  { %1001 = vmatpush1.bf16.msra.mxu0 %v1000_v51 }
  0xc4   :  { %1097 = vmatpush1.bf16.msra.mxu1 %v1096_v52  ;;  %1003 = vmatprep.subr.bf16.mxu0 %v1002_v53 }
  0xc5   :  { %1099 = vmatprep.subr.bf16.mxu1 %v1098_v57 }
  0xc7   :  { %1005 = vmatpush1.bf16.msra.mxu0 %v1004_v63 }
  0xc8   :  { %1101 = vmatpush1.bf16.msra.mxu1 %v1100_v1  ;;  %1007 = vmatprep.subr.bf16.mxu0 %v1006_v2 }
  0xc9   :  { %1103 = vmatprep.subr.bf16.mxu1 %v1102_v5 }
  0xcb   :  { %1009 = vmatpush1.bf16.msra.mxu0 %v1008_v8 }
  0xcc   :  { %1105 = vmatpush1.bf16.msra.mxu1 %v1104_v9 }
  0xce   :  { %618 = vmatmul.mubr.f32.vlgmr.msra.gmra.mrb[0].mxu0 %v79_v10 }
  0xcf   :  { %760 = vmatmul.mubr.f32.vlgmr.msra.gmra.mrb[0].mxu1 %v79_v10 }
 0x1a1   :  { %v619_v18 = vpop.f32.mrb[0].mxu0 }
 0x1a2   :  { %v788_v19 = vadd.f32 %v771_v20, %v619_v18  ;;  %v761_v21 = vpop.f32.mrb[0].mxu1  ;;  %v621_v22 = vpop.f32.mrb[1].mxu0 }
 0x1a3   :  { %v789_v23 = vadd.f32 %v775_v16, %v621_v22  ;;  %v763_v24 = vpop.f32.mrb[1].mxu1  ;;  %v790_v34 = vadd.f32 %v779_v32, %v761_v21 }
 0x1a4   :  { %v792_v26 = vsub.f32 0.0, %v788_v19  ;;  %v791_v29 = vadd.f32 %v783_v25, %v763_v24 }
 0x1a5   :  { %v798_v27 = vsub.f32 0.0, %v789_v23 }
 0x1a6   :  { %v793_v28 = vmul.f32 1.442695, %v792_v26  ;;  %v805_v31 = vsub.f32 0.0, %v791_v29 }
 0x1a7   :  { %v799_v0 = vmul.f32 1.442695, %v798_v27 }
 0x1a8   :  { %1124 = vpow2.f32 %v793_v28  ;;  %v806_v33 = vmul.f32 1.442695, %v805_v31 }
 0x1a9   :  { %1126 = vpow2.f32 %v799_v0 }
 0x1aa   :  { %1128 = vpow2.f32 %v806_v33 }
 0x1ab   :  { %1130 = vtanh.f32 %v790_v34 }
 0x1b2   :  { %v1125_v35 = vpop.eup %1124 }
 0x1b3   :  { %v1127_v36 = vpop.eup %1126  ;;  %v795_v37 = vadd.f32 1.0, %v1125_v35 }
 0x1b4   :  { %v801_v38 = vadd.f32 1.0, %v1127_v36  ;;  %v1129_v39 = vpop.eup %1128 }
 0x1b5   :  { %1132 = vrcp.f32 %v795_v37  ;;  %v1131_v40 = vpop.eup %1130  ;;  %v808_v45 = vadd.f32 1.0, %v1129_v39 }
 0x1b6   :  { %1134 = vrcp.f32 %v801_v38 }
 0x1b7   :  { %1136 = vrcp.f32 %v808_v45 }
 0x1bf   :  { %v1133_v42 = vpop.eup %1132 }
 0x1c0   :  { %v1135_v43 = vpop.eup %1134  ;;  %v813_v44 = vmul.f32 %v1133_v42, %v1131_v40 }
 0x1c1   :  { %v812_v46 = vmul.f32 %v1135_v43, %v811_v41 }
 0x1c3   :  { %v814_v47 = vadd.f32 %v813_v44, %v812_v46 }
 0x1c5   :  { %1138 = vtanh.f32 %v814_v47  ;;  %818 = vst [vmem:[#allocation11] sm:$0xf] %v814_v47 }
 0x1c6   :  { %1239 = shalt.err (!%p1236_p8)
}
 0x1c7   :  { %s1240_s8 = scalar_lea.hbm %s1426_s7, 64 }
 0x1c8   :  { %p1241_p9 = scmp.ne.s32.totalorder %s1426_s7, %s1240_s8  ;;  %p1244_p10 = scmp.lt.u32.totalorder %s1240_s8, %s1426_s7 }
 0x1ca   :  { %p1246_p11 = pnand %p1244_p10, %p1241_p9 }
 0x1cc   :  { %1249 = shalt.err (!%p1246_p11)
}
 0x1cd   :  { %838 = dma.vmem_to_hbm [thread:$0]  %s836_s28, 64, %s1426_s7, [#allocation12]   ;;  %v1137_v48 = vpop.eup %1136 }
 0x1ce   :  { %s1290_s13 = smov [#allocation10]  }
 0x1cf   :  { %s825_s14 = sshll.u32 %s1290_s13, 4  ;;  %v1139_v49 = vpop.eup %1138  ;;  %s826_s14 = int_to_ptr.vmem [resolvable:$true] %s825_s14 }
 0x1d0   :  { %v816_v50 = vmul.f32 %v1139_v49, %v1137_v48  ;;  %s1250_s15 = scalar_lea.vmem %s826_s14, 64  ;;  %p1255_p13 = scmp.lt.s32.totalorder %s826_s14, %s826_s14 }
 0x1d1   :  { %p1251_p12 = scmp.ne.s32.totalorder %s826_s14, %s1250_s15  ;;  %p1256_p0 = scmp.lt.s32.totalorder %s1250_s15, %s1250_s15 }
 0x1d2   :  { %817 = vst [vmem:[#allocation10] sm:$0xf] %v816_v50 }
 0x1d3   :  { %p1257_p1 = por %p1256_p0, %p1255_p13 }
 0x1d5   :  { %p1258_p2 = pnand %p1257_p1, %p1251_p12 }
 0x1d7   :  { %1261 = shalt.err (!%p1258_p2)
}
 0x1d8   :  { %s1262_s18 = scalar_lea.hbm %s1425_s6, 64 }
 0x1d9   :  { %p1263_p3 = scmp.ne.s32.totalorder %s1425_s6, %s1262_s18  ;;  %p1266_p4 = scmp.lt.u32.totalorder %s1262_s18, %s1425_s6 }
 0x1db   :  { %p1268_p5 = pnand %p1266_p4, %p1263_p3 }
 0x1dd   :  { %1271 = shalt.err (!%p1268_p5)
}
 0x1de   :  { %828 = dma.vmem_to_hbm [thread:$0]  %s826_s14, 64, %s1425_s6, [#allocation4]  }
 0x1df   :  { %1278 = dma.done.wait [#allocation4], 64  }
 0x1e0   :  { %1279 = vsyncadd [#allocation4], 4294967232 }
 0x1e1   :  { %1280 = dma.done.wait [#allocation12], 64  }
 0x1e2   :  { %1281 = vsyncadd [#allocation12], 4294967232 }
 0x1e3   :  { %845 = vsyncpa [#allocation3], 1 }
 0x1e4   :  { %846 = vsyncpa [#allocation6], 1 }
 0x1e5   :  { %847 = vsyncpa [#allocation9], 1 }
 0x1e6   :  { %848 = vsyncpa [#allocation4], 1 }
 0x1e7   :  { %849 = vsyncpa [#allocation12], 1 }

</bundles_post_ra>
